<compile_context>
chip_gen: v5e
topology: v5e:2x2
jax: 0.10.0
libtpu: 0.0.40
codegen_flags: <defaults>
</compile_context>

<pallas_src>
import functools

import jax
import jax.numpy as jnp
from jax.experimental import pallas as pl
from jax.experimental.pallas import tpu as pltpu


def _cond_linear_kernel(t_ref, x_ref, w_ref, b_ref, g_ref, o_ref):
    # t_ref: scalar-prefetch ref (consumed only by the gamma index_map).
    # x_ref: (TN, n_in)       f32   (cast to bf16 here, on the VPU)
    # w_ref: (n_in, n_out_p)  bf16
    # b_ref: (1, n_out_p)     f32
    # g_ref: (1, 1, n_out_p)  f32   gamma = embed.weight[t] via index_map
    # o_ref: (TN, n_out_p)    bf16
    del t_ref
    x_bf16 = x_ref[...].astype(jnp.bfloat16)
    acc = jnp.dot(x_bf16, w_ref[...], preferred_element_type=jnp.float32)
    gamma = g_ref[0]                                   # (1, n_out_p), f32
    o_ref[...] = (gamma * (acc + b_ref[...])).astype(o_ref.dtype)


def _round_up(v, m):
    return ((v + m - 1) // m) * m


def _pick_tn(n_pad):
    """Batch tile size. n_pad is a multiple of 8.

    - small batches: split into 2 tiles when possible so the "parallel" grid
      axis can shard across v7x's 2 TensorCores,
    - large batches: tiles up to 1024 rows amortize the ~0.35 us per-step
      overhead (v6e/v5e) while still leaving >= 2 grid steps.
    """
    if n_pad <= 256:
        return n_pad
    return min(1024, _round_up(pl.cdiv(n_pad, 2), 8))


def prepare_params(weight, bias, embed):
    """One-time parameter prep.

    weight: [n_inputs, n_outputs]   (transposed vs. PyTorch nn.Linear.weight)
    bias:   [n_outputs]
    embed:  [n_steps, n_outputs]    (nn.Embedding weight after .uniform_())
    """
    n_in, n_out = weight.shape
    n_steps = embed.shape[0]

    # Lane-pad the feature dim only when the byte inflation is modest (<= 2x).
    # For tiny n_out the natural width (masked vst) writes far fewer HBM bytes.
    n_out_128 = _round_up(n_out, 128)
    n_out_p = n_out_128 if n_out_128 <= 2 * n_out else n_out
    pad = n_out_p - n_out

    w_p = jnp.pad(weight, ((0, 0), (0, pad))).astype(jnp.bfloat16)          # [n_in, n_out_p]
    b_p = jnp.pad(bias, (0, pad)).reshape(1, n_out_p).astype(jnp.float32)    # [1, n_out_p]
    e_p = jnp.pad(embed, ((0, 0), (0, pad)))                                 # [n_steps, n_out_p]
    e_p = e_p.reshape(n_steps, 1, n_out_p).astype(jnp.float32)               # leading row-select dim
    return dict(w=w_p, b=b_p, embed=e_p, n_out=n_out, n_in=n_in)


@functools.partial(jax.jit, static_argnames=("tn",))
def _run(x_p, t_arr, w_p, b_p, e_p, tn):
    n_pad, n_in = x_p.shape
    n_out_p = w_p.shape[1]
    grid = (pl.cdiv(n_pad, tn),)   # ragged last tile is masked by Pallas

    # Explicit VMEM budget hint (v7x: 64 MiB physical / 32 MiB default scoped).
    # Double-buffered x/out tiles + resident W/bias/gamma, with generous margin.
    tile_bytes = 2 * (tn * n_in * 4 + tn * n_out_p * 2)          # x(f32) + out(bf16)
    resident_bytes = 2 * (n_in * n_out_p * 2 + 2 * n_out_p * 4)  # W(bf16) + bias/gamma(f32)
    vmem_limit = int(min(max(4 * (tile_bytes + resident_bytes), 16 << 20), 56 << 20))

    out = pl.pallas_call(
        _cond_linear_kernel,
        out_shape=jax.ShapeDtypeStruct((n_pad, n_out_p), jnp.bfloat16),
        grid_spec=pltpu.PrefetchScalarGridSpec(
            num_scalar_prefetch=1,           # t lives in SMEM, drives the gamma index_map
            grid=grid,
            in_specs=[
                pl.BlockSpec((tn, n_in), lambda i, t_ref: (i, 0)),          # x tile (f32)
                pl.BlockSpec((n_in, n_out_p), lambda i, t_ref: (0, 0)),     # W (resident)
                pl.BlockSpec((1, n_out_p), lambda i, t_ref: (0, 0)),        # bias (resident)
                pl.BlockSpec((1, 1, n_out_p),                               # gamma = embed[t]
                             lambda i, t_ref: (t_ref[0], 0, 0)),
            ],
            out_specs=pl.BlockSpec((tn, n_out_p), lambda i, t_ref: (i, 0)),
        ),
        compiler_params=pltpu.CompilerParams(
            dimension_semantics=("parallel",),
            vmem_limit_bytes=vmem_limit),
    )(t_arr, x_p, w_p, b_p, e_p)
    return out


def conditional_linear_forward(x, t, params):
    """Forward pass matching ConditionalLinear.forward.

    x: [N, n_inputs] float
    t: [1] int       diffusion-step index
    Returns [N, n_outputs] bfloat16 (accumulation / epilogue done in f32).
    """
    n, n_in = x.shape
    assert n_in == params["n_in"]
    n_out = params["n_out"]
    n_out_p = params["w"].shape[1]

    n_pad = _round_up(max(n, 8), 8)     # only sublane-align the batch; grid handles the rest
    x_p = x.astype(jnp.float32)
    if n_pad != n:
        x_p = jnp.pad(x_p, ((0, n_pad - n), (0, 0)))
    t_arr = jnp.asarray(t, dtype=jnp.int32).reshape(-1)[:1]

    tn = _pick_tn(n_pad)
    out = _run(x_p, t_arr, params["w"], params["b"], params["embed"], tn)
    if n_pad != n or n_out_p != n_out:
        out = out[:n, :n_out]
    return out


def init_raw_params(key, n_inputs, n_outputs, n_steps):
    """Mimic PyTorch defaults: nn.Linear U(-1/sqrt(fan_in), ...), embedding U(0,1)."""
    kw, kb, ke = jax.random.split(key, 3)
    bound = 1.0 / jnp.sqrt(n_inputs)
    weight = jax.random.uniform(kw, (n_inputs, n_outputs), jnp.float32, -bound, bound)
    bias = jax.random.uniform(kb, (n_outputs,), jnp.float32, -bound, bound)
    embed = jax.random.uniform(ke, (n_steps, n_outputs), jnp.float32, 0.0, 1.0)
    return weight, bias, embed


if __name__ == "__main__":
    n_steps = 10
    n_inputs = 16
    n_outputs = 8

    key = jax.random.PRNGKey(0)
    k_p, k_x1, k_x2 = jax.random.split(key, 3)

    weight, bias, embed = init_raw_params(k_p, n_inputs, n_outputs, n_steps)
    params = prepare_params(weight, bias, embed)
    t = jnp.array([3], dtype=jnp.int32)

    # Case 1: small batch (single grid step).
    x1 = jax.random.normal(k_x1, (8, n_inputs), jnp.float32)
    out1 = conditional_linear_forward(x1, t, params)
    jax.block_until_ready(out1)
    assert out1.shape == (8, n_outputs)
    ref1 = embed[t].reshape(1, n_outputs) * (x1 @ weight + bias)
    assert jnp.allclose(out1.astype(jnp.float32), ref1, rtol=2e-2, atol=2e-2), "mismatch (case 1)"

    # Case 2: batch that exercises a multi-step grid with a ragged, masked last tile.
    x2 = jax.random.normal(k_x2, (260, n_inputs), jnp.float32)
    out2 = conditional_linear_forward(x2, t, params)
    jax.block_until_ready(out2)
    assert out2.shape == (260, n_outputs)
    ref2 = embed[t].reshape(1, n_outputs) * (x2 @ weight + bias)
    assert jnp.allclose(out2.astype(jnp.float32), ref2, rtol=2e-2, atol=2e-2), "mismatch (case 2)"

    print("KERNEL_OK")
</pallas_src>

<mosaic_0001>
module attributes {stable_mosaic.version = 11 : i64} {
  func.func @_cond_linear_kernel(%arg0: i32, %arg1: memref<1xi32, #tpu.memory_space<smem>>, %arg2: memref<8x16xf32, #tpu.memory_space<vmem>>, %arg3: memref<16x8xbf16, #tpu.memory_space<vmem>>, %arg4: memref<1x8xf32, #tpu.memory_space<vmem>>, %arg5: memref<1x1x8xf32, #tpu.memory_space<vmem>>, %arg6: memref<8x8xbf16, #tpu.memory_space<vmem>>) attributes {dimension_semantics = [#tpu.dimension_semantics<parallel>], iteration_bounds = array<i64: 1>, scalar_prefetch = 1 : i64, scratch_operands = 0 : i64, tpu.core_type = #tpu.core_type<tc>, window_params = [{transform_indices = @transform_0, window_bounds = array<i64: 8, 16>}, {pipeline_mode = #tpu.pipeline_mode<synchronous>, transform_indices = @transform_1, window_bounds = array<i64: 16, 8>}, {pipeline_mode = #tpu.pipeline_mode<synchronous>, transform_indices = @transform_2, window_bounds = array<i64: 1, 8>}, {transform_indices = @transform_3, window_bounds = array<i64: 1, 1, 8>}, {transform_indices = @transform_4, window_bounds = array<i64: 8, 8>}]} {
    %c0 = arith.constant 0 : index
    %c0_0 = arith.constant 0 : index
    %0 = vector.load %arg2[%c0, %c0_0] : memref<8x16xf32, #tpu.memory_space<vmem>>, vector<8x16xf32>
    %1 = arith.truncf %0 : vector<8x16xf32> to vector<8x16xbf16>
    %c0_1 = arith.constant 0 : index
    %c0_2 = arith.constant 0 : index
    %2 = vector.load %arg3[%c0_1, %c0_2] : memref<16x8xbf16, #tpu.memory_space<vmem>>, vector<16x8xbf16>
    %cst = arith.constant dense<0.000000e+00> : vector<8x8xf32>
    %3 = tpu.matmul %1, %2, %cst {dimension_numbers = #tpu.dot_dimension_numbers<[1], [0], [0], [1], [0, 0, 1, 1], [], []>} : vector<8x16xbf16>, vector<16x8xbf16>, vector<8x8xf32> -> vector<8x8xf32>
    %c0_3 = arith.constant 0 : index
    %c0_4 = arith.constant 0 : index
    %c0_5 = arith.constant 0 : index
    %4 = vector.load %arg5[%c0_3, %c0_4, %c0_5] : memref<1x1x8xf32, #tpu.memory_space<vmem>>, vector<1x1x8xf32>
    %5 = vector.shape_cast %4 : vector<1x1x8xf32> to vector<1x8xf32>
    %c0_6 = arith.constant 0 : index
    %c0_7 = arith.constant 0 : index
    %6 = vector.load %arg4[%c0_6, %c0_7] : memref<1x8xf32, #tpu.memory_space<vmem>>, vector<1x8xf32>
    %7 = vector.broadcast %6 : vector<1x8xf32> to vector<8x8xf32>
    %8 = arith.addf %3, %7 : vector<8x8xf32>
    %9 = vector.broadcast %5 : vector<1x8xf32> to vector<8x8xf32>
    %10 = arith.mulf %9, %8 : vector<8x8xf32>
    %11 = arith.truncf %10 : vector<8x8xf32> to vector<8x8xbf16>
    %c0_8 = arith.constant 0 : index
    %c0_9 = arith.constant 0 : index
    %12 = vector.load %arg6[%c0_8, %c0_9] : memref<8x8xbf16, #tpu.memory_space<vmem>>, vector<8x8xbf16>
    tpu.vector_store %arg6[%c0_8, %c0_9], %11 {strides = array<i32>} : memref<8x8xbf16, #tpu.memory_space<vmem>>, vector<8x8xbf16>,
    return
  }
  func.func @transform_0(%arg0: i32, %arg1: memref<1xi32, #tpu.memory_space<smem>>) -> (i32, i32) {
    %c0_i32 = arith.constant 0 : i32
    %c0_i32_0 = arith.constant 0 : i32
    return %arg0, %c0_i32 : i32, i32
  }
  func.func @transform_1(%arg0: i32, %arg1: memref<1xi32, #tpu.memory_space<smem>>) -> (i32, i32) {
    %c0_i32 = arith.constant 0 : i32
    %c0_i32_0 = arith.constant 0 : i32
    %c0_i32_1 = arith.constant 0 : i32
    return %c0_i32, %c0_i32_0 : i32, i32
  }
  func.func @transform_2(%arg0: i32, %arg1: memref<1xi32, #tpu.memory_space<smem>>) -> (i32, i32) {
    %c0_i32 = arith.constant 0 : i32
    %c0_i32_0 = arith.constant 0 : i32
    %c0_i32_1 = arith.constant 0 : i32
    return %c0_i32, %c0_i32_0 : i32, i32
  }
  func.func @transform_3(%arg0: i32, %arg1: memref<1xi32, #tpu.memory_space<smem>>) -> (i32, i32, i32) {
    %c0 = arith.constant 0 : index
    %0 = memref.load %arg1[%c0] : memref<1xi32, #tpu.memory_space<smem>>
    %c0_i32 = arith.constant 0 : i32
    %c0_i32_0 = arith.constant 0 : i32
    %c0_i32_1 = arith.constant 0 : i32
    return %0, %c0_i32, %c0_i32_0 : i32, i32, i32
  }
  func.func @transform_4(%arg0: i32, %arg1: memref<1xi32, #tpu.memory_space<smem>>) -> (i32, i32) {
    %c0_i32 = arith.constant 0 : i32
    %c0_i32_0 = arith.constant 0 : i32
    return %arg0, %c0_i32 : i32, i32
  }
}

</mosaic_0001>

<bundles_post_ra>
// kernel: _run.1
= control target key start
LH: loop header
LB: loop body
LE: loop exit
PB: predicated region body
PF: predicated region fallthrough
CT: control target
= control target key end

     0   :  { %s180_s0 = inlined_call_operand.<no memory space> [shape: s32[1], index: 0, kind: input, shape index: {}]   ;;  %s181_s1 = inlined_call_operand.vmem [shape: f32[8,16], index: 1, kind: input, shape index: {}]   ;;  %s182_s2 = inlined_call_operand.vmem [shape: bf16[16,8], index: 2, kind: input, shape index: {}]   ;;  %s183_s3 = inlined_call_operand.vmem [shape: f32[1,8], index: 3, kind: input, shape index: {}]   ;;  %s184_s4 = inlined_call_operand.vmem [shape: f32[10,1,8], index: 4, kind: input, shape index: {}]   ;;  %s185_s5 = inlined_call_operand.hbm [shape: bf16[8,8], index: 5, kind: output, shape index: {}]  }
   0x1   :  { %v98_v0 = vld [vmem:[%s182_s2] sm:$0xff]  ;;  %p30_p0 = scmp.lt.s32.totalorder %s180_s0, 9 }
   0x2   :  { %v35_v1 = vld [vmem:[%s181_s1] sm:$0xff] }
   0x3   :  { %v36_v2 = vpack.c.bf16 %v35_v1, %v35_v1 }
   0x4   :  { %11 = vsyncpa [#allocation5], 0  ;;  %61 = vmatpush.bf16.msra.mxu0 %v98_v0  ;;  %vm50_vm0 = vcmask 130048   ;;  %s187_s0 = smov (!%p30_p0, %s180_s0), 9  ;;  %v100_v3 = vld [vmem:[%s183_s3] ss:$0 sm:$0xff] }
   0x5   :  { %s32_s2 = scalar_lea.vmem %s184_s4, %s187_s0  ;;  %s128_s1 = smov [#allocation4]   ;;  %vm72_vm1 = vcmask 60416  }
   0x6   :  { %v101_v4 = vld [vmem:[%s32_s2] ss:$0 sm:$0xff]  ;;  %s79_s30 = sshll.u32 %s128_s1, 4  ;;  %s81_s8 = sshll.u32 %s185_s5, 4  ;;  %s80_s30 = int_to_ptr.vmem [resolvable:$true] %s79_s30  ;;  %s82_s8 = int_to_ptr.hbm [resolvable:$true] %s81_s8 }
   0x7   :  { %97 = vmatmul.msk.bf16.vlgmr.msra.gmra.mxu0 %vm50_vm0, %v36_v2 }
  0x84   :  { %v63_v5 = vpop.f32.mrf.mxu0 }
  0x85   :  { %v64_v6 = vadd.f32 %v100_v3, %v63_v5 }
  0x87   :  { %v70_v7 = vmul.f32 %v101_v4, %v64_v6 }
  0x89   :  { %v71_v8 = vpack.c.bf16 %v70_v7, %v70_v7 }
  0x8b   :  { %73 = vst.msk [vmem:[#allocation4] sm:$0xf] %vm72_vm1, %v71_v8 }
  0x8c   :  { %v65_v9 = vpop.f32.mrf.mxu0  ;;  %84 = dma.vmem_to_hbm [thread:$0]  %s80_s30, 64, %s82_s8, [#allocation5]  }
  0x8d   :  { %126 = dma.done.wait [#allocation5], 64  }
  0x8e   :  { %127 = vsyncadd [#allocation5], 4294967232 }
  0x8f   :  { %89 = vsyncpa [#allocation5], 1 }

</bundles_post_ra>
